<compile_context>
chip_gen: v6e
topology: v6e:2x2x1
jax: 0.10.0
libtpu: 0.0.40
codegen_flags: <defaults>
</compile_context>

<pallas_src>
import jax
import jax.numpy as jnp
from jax.experimental import pallas as pl
from jax.experimental.pallas import tpu as pltpu


# ----------------------------------------------------------------------------- kernel


def _make_kernel(tk, slice_weight):
    """tk: K-tile size.  slice_weight: weight ref holds the whole (K_pad, F) array
    (resident in VMEM) and must be sliced by the k grid index."""

    def kernel(x_ref, w_ref, b_ref, pooled_ref, aux_ref):
        # x_ref:      (TB*V, TK)        f32  -- cast to bf16 in-kernel
        # w_ref:      (TK, F) or (K, F) bf16
        # b_ref:      (1, F)            f32
        # pooled_ref: (TB, F)           f32
        # aux_ref:    (TB*V, F)         f32  -- doubles as the K-reduction accumulator
        k = pl.program_id(1)

        @pl.when(k == 0)
        def _():
            # Seed the resident aux block with the (view-invariant) bias so the
            # epilogue needs no extra read-modify-write pass over the block.
            aux_ref[...] = jnp.broadcast_to(b_ref[...], aux_ref.shape)

        if slice_weight:
            start = pl.multiple_of(k * tk, tk)
            w = w_ref[pl.ds(start, tk), :]
        else:
            w = w_ref[...]

        # bf16 x bf16 -> f32 accumulate on the MXU; the x cast rides the VPU slot.
        aux_ref[...] += jnp.dot(x_ref[...].astype(jnp.bfloat16), w,
                                preferred_element_type=jnp.float32)

        @pl.when(k == pl.num_programs(1) - 1)
        def _():
            tb = pooled_ref.shape[0]
            v = aux_ref.shape[0] // tb
            # Per-batch max over views (rows are batch-major: row = i*V + j).
            # The V strided reads together touch the block exactly once.
            m = aux_ref[pl.ds(0, tb, stride=v), :]
            for j in range(1, v):
                m = jnp.maximum(m, aux_ref[pl.ds(j, tb, stride=v), :])
            pooled_ref[...] = m            # dense (TB, F) store

    return kernel


# ----------------------------------------------------------------------------- planning


def _vmem_capacity_bytes():
    try:
        return int(pltpu.get_tpu_info().vmem_capacity_bytes)
    except Exception:
        return 64 * 1024 * 1024            # conservative: v7x per-TensorCore VMEM


def _choose_tb(B, V, min_rows=256, max_rows=1024):
    """Batch-tile size.  Block-shape rules: TB divides B; TB % 8 == 0 (pooled
    block) and (TB*V) % 8 == 0 (x / aux rows), unless TB == B (full-dim blocks
    are always legal)."""
    def valid(d):
        return d == B or (d % 8 == 0 and (d * V) % 8 == 0)

    divs = [d for d in range(1, B + 1) if B % d == 0 and valid(d)]
    # Prefer >= 2 batch steps (keeps both v7x TensorCores busy) with a large
    # enough matmul M per step; otherwise the largest tile that is not huge.
    good = [d for d in divs if d < B and min_rows <= d * V <= max_rows]
    if good:
        return max(good)
    under = [d for d in divs if d * V <= max_rows]
    if under:
        return max(under)
    return min(divs)


def _plan_k(K, M, x_tile_budget, max_tk=4096):
    """Pick (K_pad, TK).  TK must be a 128-multiple or span the full K."""
    def best_aligned_tile(k_total):
        cap = max(128, min(max_tk, x_tile_budget // (4 * M)))
        cap = min(cap, k_total)
        best = 128
        for tk in range(128, cap + 1, 128):
            if k_total % tk == 0:
                best = tk
        return best

    if K % 128 == 0:
        return K, best_aligned_tile(K)
    if 4 * M * K <= x_tile_budget:
        return K, K                        # one full-K block, no padding needed
    # Rare: unaligned K too big for one block -> zero-pad (one extra HBM pass).
    k_pad = ((K + 127) // 128) * 128
    return k_pad, best_aligned_tile(k_pad)


# ----------------------------------------------------------------------------- wrapper


def view_max_aggregate(mvimages, weight, bias):
    """mvimages: (B, V, C, D, H, W) f32; weight: (K, F) (ideally pre-cast bf16);
    bias: (F,).  Returns (pooled.squeeze(), aux) like the PyTorch module."""
    B, V, C, D, H, W = mvimages.shape
    K = C * D * H * W
    F = weight.shape[1]

    cap = _vmem_capacity_bytes()
    x_tile_budget = (16 << 20) if cap >= (96 << 20) else (8 << 20)

    TB = _choose_tb(B, V)
    M = TB * V
    K_pad, TK = _plan_k(K, M, x_tile_budget)

    # "batch_tensor" flatten of the per-view volume (free, row-major); stays f32 —
    # the bf16 cast happens inside the kernel.
    x = mvimages.reshape(B * V, K)
    w = weight if weight.dtype == jnp.bfloat16 else weight.astype(jnp.bfloat16)
    if K_pad != K:
        # TODO(synk): rare path — unaligned K too large for a single block; the
        # zero-pad costs one extra HBM pass over x.
        x = jnp.pad(x, ((0, 0), (0, K_pad - K)))
        w = jnp.pad(w, ((0, K_pad - K), (0, 0)))
    bias2d = bias.reshape(1, F).astype(jnp.float32)

    n_k = K_pad // TK
    # Keep the whole bf16 weight resident in VMEM (fetched from HBM exactly once,
    # since its block index never changes) whenever it fits the budget.
    weight_resident = 2 * K_pad * F * 2 <= (12 << 20)
    slice_weight = weight_resident and n_k > 1
    if weight_resident:
        w_spec = pl.BlockSpec((K_pad, F), lambda b, k: (0, 0))
        w_rows = K_pad
    else:
        w_spec = pl.BlockSpec((TK, F), lambda b, k: (k, 0))
        w_rows = TK

    # VMEM limit from the actual double-buffered working set (+ margin), clamped
    # below physical capacity minus headroom.
    need = (2 * M * TK * 4            # x tiles (f32)
            + 2 * w_rows * F * 2      # weight (bf16)
            + 2 * M * F * 4           # aux output block
            + 2 * max(TB, 8) * F * 4  # pooled output block (sublane-padded)
            + 2 * 8 * F * 4)          # bias
    vmem_limit = max(32 << 20, need + (8 << 20))
    vmem_limit = min(vmem_limit, max(cap - (8 << 20), need + (4 << 20)))

    grid = (B // TB, n_k)

    pooled, aux2d = pl.pallas_call(
        _make_kernel(TK, slice_weight),
        out_shape=(
            jax.ShapeDtypeStruct((B, F), jnp.float32),       # pooled_view
            jax.ShapeDtypeStruct((B * V, F), jnp.float32),   # aux (flat, lane-dense)
        ),
        grid_spec=pltpu.PrefetchScalarGridSpec(
            num_scalar_prefetch=0,
            grid=grid,
            in_specs=[
                pl.BlockSpec((M, TK), lambda b, k: (b, k)),   # x (f32)
                w_spec,                                       # weight (bf16)
                pl.BlockSpec((1, F), lambda b, k: (0, 0)),    # bias
            ],
            out_specs=[
                pl.BlockSpec((TB, F), lambda b, k: (b, 0)),   # pooled
                pl.BlockSpec((M, F), lambda b, k: (b, 0)),    # aux (accumulator)
            ],
        ),
        compiler_params=pltpu.CompilerParams(
            dimension_semantics=("parallel", "arbitrary"),
            vmem_limit_bytes=int(vmem_limit),
        ),
        cost_estimate=pl.CostEstimate(
            flops=2 * B * V * K_pad * F,
            transcendentals=0,
            bytes_accessed=(B * V * K_pad * 4 + K_pad * F * 2
                            + B * V * F * 4 + B * F * 4),
        ),
    )(x, w, bias2d)

    aux = aux2d.reshape(B, V, F)
    # torch.max(aux, dim=1)[0].squeeze()
    return jnp.squeeze(pooled), aux


# ----------------------------------------------------------------------------- demo


if __name__ == "__main__":
    # Small shapes consistent with the (B, V, C, D, H, W) forward signature.
    B, V, C, D, H, W = 16, 4, 2, 4, 8, 8
    K = C * D * H * W          # 512
    F = 128                    # synthetic backbone feature dim

    key = jax.random.PRNGKey(0)
    k_x, k_w, k_b = jax.random.split(key, 3)

    mvimages = jax.random.normal(k_x, (B, V, C, D, H, W), dtype=jnp.float32)
    # Deterministic synthetic backbone params (Linear: K -> F); weight pre-cast
    # to bf16 once (it is a parameter, not per-call work).
    weight_f32 = jax.random.normal(k_w, (K, F), dtype=jnp.float32) * 0.02
    weight = weight_f32.astype(jnp.bfloat16)
    bias = jax.random.normal(k_b, (F,), dtype=jnp.float32) * 0.02

    pooled, aux = view_max_aggregate(mvimages, weight, bias)
    jax.block_until_ready((pooled, aux))

    # Reference in plain JAX, using the same bf16-input / f32-accumulate math.
    x2d = mvimages.reshape(B * V, K)
    aux_ref = (jnp.dot(x2d.astype(jnp.bfloat16), weight,
                       preferred_element_type=jnp.float32)
               + bias).reshape(B, V, F)
    pooled_ref = jnp.squeeze(jnp.max(aux_ref, axis=1))

    assert aux.shape == (B, V, F) and pooled.shape == (B, F)
    assert jnp.allclose(aux, aux_ref, atol=2e-3, rtol=2e-3)
    assert jnp.allclose(pooled, pooled_ref, atol=2e-3, rtol=2e-3)

    print("KERNEL_OK")
</pallas_src>

<mosaic_0001>
module attributes {stable_mosaic.version = 11 : i64} {
  func.func @kernel(%arg0: i32, %arg1: i32, %arg2: memref<64x512xf32, #tpu.memory_space<vmem>>, %arg3: memref<512x128xbf16, #tpu.memory_space<vmem>>, %arg4: memref<1x128xf32, #tpu.memory_space<vmem>>, %arg5: memref<16x128xf32, #tpu.memory_space<vmem>>, %arg6: memref<64x128xf32, #tpu.memory_space<vmem>>) attributes {dimension_semantics = [#tpu.dimension_semantics<parallel>, #tpu.dimension_semantics<arbitrary>], iteration_bounds = array<i64: 1, 1>, scalar_prefetch = 0 : i64, scratch_operands = 0 : i64, tpu.core_type = #tpu.core_type<tc>, window_params = [{transform_indices = @transform_0, window_bounds = array<i64: 64, 512>}, {pipeline_mode = #tpu.pipeline_mode<synchronous>, transform_indices = @transform_1, window_bounds = array<i64: 512, 128>}, {pipeline_mode = #tpu.pipeline_mode<synchronous>, transform_indices = @transform_2, window_bounds = array<i64: 1, 128>}, {transform_indices = @transform_3, window_bounds = array<i64: 16, 128>}, {transform_indices = @transform_4, window_bounds = array<i64: 64, 128>}]} {
    %c0_i32 = arith.constant 0 : i32
    %0 = arith.cmpi eq, %arg1, %c0_i32 : i32
    %1 = arith.extui %0 : i1 to i32
    %c0_i32_0 = arith.constant 0 : i32
    %2 = arith.cmpi ne, %1, %c0_i32_0 : i32
    scf.if %2 {
      %c0_10 = arith.constant 0 : index
      %c0_11 = arith.constant 0 : index
      %13 = vector.load %arg4[%c0_10, %c0_11] : memref<1x128xf32, #tpu.memory_space<vmem>>, vector<1x128xf32>
      %14 = vector.shape_cast %13 : vector<1x128xf32> to vector<1x128xf32>
      %15 = vector.broadcast %14 : vector<1x128xf32> to vector<64x128xf32>
      %c0_12 = arith.constant 0 : index
      %c0_13 = arith.constant 0 : index
      %16 = vector.load %arg6[%c0_12, %c0_13] : memref<64x128xf32, #tpu.memory_space<vmem>>, vector<64x128xf32>
      tpu.vector_store %arg6[%c0_12, %c0_13], %15 {strides = array<i32>} : memref<64x128xf32, #tpu.memory_space<vmem>>, vector<64x128xf32>,
    } else {
    }
    %c0 = arith.constant 0 : index
    %c0_1 = arith.constant 0 : index
    %3 = vector.load %arg3[%c0, %c0_1] : memref<512x128xbf16, #tpu.memory_space<vmem>>, vector<512x128xbf16>
    %c0_2 = arith.constant 0 : index
    %c0_3 = arith.constant 0 : index
    %4 = vector.load %arg6[%c0_2, %c0_3] : memref<64x128xf32, #tpu.memory_space<vmem>>, vector<64x128xf32>
    %c0_4 = arith.constant 0 : index
    %c0_5 = arith.constant 0 : index
    %5 = vector.load %arg2[%c0_4, %c0_5] : memref<64x512xf32, #tpu.memory_space<vmem>>, vector<64x512xf32>
    %6 = arith.truncf %5 : vector<64x512xf32> to vector<64x512xbf16>
    %cst = arith.constant dense<0.000000e+00> : vector<64x128xf32>
    %7 = tpu.matmul %6, %3, %cst {dimension_numbers = #tpu.dot_dimension_numbers<[1], [0], [0], [1], [0, 0, 1, 1], [], []>} : vector<64x512xbf16>, vector<512x128xbf16>, vector<64x128xf32> -> vector<64x128xf32>
    %8 = arith.addf %4, %7 : vector<64x128xf32>
    %c0_6 = arith.constant 0 : index
    %c0_7 = arith.constant 0 : index
    %9 = vector.load %arg6[%c0_6, %c0_7] : memref<64x128xf32, #tpu.memory_space<vmem>>, vector<64x128xf32>
    tpu.vector_store %arg6[%c0_6, %c0_7], %8 {strides = array<i32>} : memref<64x128xf32, #tpu.memory_space<vmem>>, vector<64x128xf32>,
    %c0_i32_8 = arith.constant 0 : i32
    %10 = arith.cmpi eq, %arg1, %c0_i32_8 : i32
    %11 = arith.extui %10 : i1 to i32
    %c0_i32_9 = arith.constant 0 : i32
    %12 = arith.cmpi ne, %11, %c0_i32_9 : i32
    scf.if %12 {
      %c0_10 = arith.constant 0 : index
      %c0_11 = arith.constant 0 : index
      %13 = tpu.strided_load %arg6[%c0_10, %c0_11] {strides = array<i32: 4, 1>} : memref<64x128xf32, #tpu.memory_space<vmem>>, vector<16x128xf32>
      %c1 = arith.constant 1 : index
      %c0_12 = arith.constant 0 : index
      %14 = tpu.strided_load %arg6[%c1, %c0_12] {strides = array<i32: 4, 1>} : memref<64x128xf32, #tpu.memory_space<vmem>>, vector<16x128xf32>
      %15 = arith.maximumf %13, %14 : vector<16x128xf32>
      %c2 = arith.constant 2 : index
      %c0_13 = arith.constant 0 : index
      %16 = tpu.strided_load %arg6[%c2, %c0_13] {strides = array<i32: 4, 1>} : memref<64x128xf32, #tpu.memory_space<vmem>>, vector<16x128xf32>
      %17 = arith.maximumf %15, %16 : vector<16x128xf32>
      %c3 = arith.constant 3 : index
      %c0_14 = arith.constant 0 : index
      %18 = tpu.strided_load %arg6[%c3, %c0_14] {strides = array<i32: 4, 1>} : memref<64x128xf32, #tpu.memory_space<vmem>>, vector<16x128xf32>
      %19 = arith.maximumf %17, %18 : vector<16x128xf32>
      %c0_15 = arith.constant 0 : index
      %c0_16 = arith.constant 0 : index
      %20 = vector.load %arg5[%c0_15, %c0_16] : memref<16x128xf32, #tpu.memory_space<vmem>>, vector<16x128xf32>
      tpu.vector_store %arg5[%c0_15, %c0_16], %19 {strides = array<i32>} : memref<16x128xf32, #tpu.memory_space<vmem>>, vector<16x128xf32>,
    } else {
    }
    return
  }
  func.func @transform_0(%arg0: i32, %arg1: i32) -> (i32, i32) {
    %c0_i32 = arith.constant 0 : i32
    return %arg0, %arg1 : i32, i32
  }
  func.func @transform_1(%arg0: i32, %arg1: i32) -> (i32, i32) {
    %c0_i32 = arith.constant 0 : i32
    %c0_i32_0 = arith.constant 0 : i32
    %c0_i32_1 = arith.constant 0 : i32
    return %c0_i32, %c0_i32_0 : i32, i32
  }
  func.func @transform_2(%arg0: i32, %arg1: i32) -> (i32, i32) {
    %c0_i32 = arith.constant 0 : i32
    %c0_i32_0 = arith.constant 0 : i32
    %c0_i32_1 = arith.constant 0 : i32
    return %c0_i32, %c0_i32_0 : i32, i32
  }
  func.func @transform_3(%arg0: i32, %arg1: i32) -> (i32, i32) {
    %c0_i32 = arith.constant 0 : i32
    %c0_i32_0 = arith.constant 0 : i32
    return %arg0, %c0_i32 : i32, i32
  }
  func.func @transform_4(%arg0: i32, %arg1: i32) -> (i32, i32) {
    %c0_i32 = arith.constant 0 : i32
    %c0_i32_0 = arith.constant 0 : i32
    return %arg0, %c0_i32 : i32, i32
  }
}

</mosaic_0001>

<bundles_post_ra>
// kernel: tpu_custom_call.1
= control target key start
LH: loop header
LB: loop body
LE: loop exit
PB: predicated region body
PF: predicated region fallthrough
CT: control target
= control target key end

     0   :  { %10 = vsyncpa [#allocation3], 0  ;;  %s887_s0 = inlined_call_operand.hbm [shape: f32[64,512], index: 0, kind: input, shape index: {}]   ;;  %s888_s1 = inlined_call_operand.hbm [shape: bf16[512,128], index: 1, kind: input, shape index: {}]   ;;  %s889_s2 = inlined_call_operand.vmem [shape: f32[1,128], index: 2, kind: input, shape index: {}]   ;;  %s890_s3 = inlined_call_operand.hbm [shape: f32[16,128], index: 3, kind: output, shape index: {0}]   ;;  %s891_s4 = inlined_call_operand.hbm [shape: f32[64,128], index: 4, kind: output, shape index: {1}]  }
   0x1   :  { %11 = vsyncpa [#allocation6], 0 }
   0x2   :  { %12 = vsyncpa [#allocation4], 0 }
   0x3   :  { %13 = vsyncpa [#allocation9], 0  ;;  %s827_s15 = smov [#allocation2]  }
   0x4   :  { %s19_s16 = sshll.u32 %s827_s15, 4  ;;  %s20_s16 = int_to_ptr.vmem [resolvable:$true] %s19_s16 }
   0x5   :  { %s747_s17 = scalar_lea.vmem %s20_s16, 4096  ;;  %p752_p1 = scmp.lt.s32.totalorder %s20_s16, %s20_s16 }
   0x6   :  { %p748_p0 = scmp.ne.s32.totalorder %s20_s16, %s747_s17  ;;  %p753_p2 = scmp.lt.s32.totalorder %s747_s17, %s747_s17 }
   0x8   :  { %p754_p3 = por %p753_p2, %p752_p1 }
   0xa   :  { %p755_p4 = pnand %p754_p3, %p748_p0 }
   0xc   :  { %758 = shalt.err (!%p755_p4)
}
   0xd   :  { %s828_s18 = smov 512   ;;  %s829_s19 = smov 32  }
   0xe   :  { %25 = dma.hbm_to_vmem [thread:$0]  %s887_s0, 4096, %s20_s16, [#allocation3], %s828_s18, %s828_s18, %s829_s19  }
   0xf   :  { %s830_s22 = smov [#allocation5]  }
  0x10   :  { %s31_s23 = sshll.u32 %s830_s22, 4  ;;  %s32_s23 = int_to_ptr.vmem [resolvable:$true] %s31_s23 }
  0x11   :  { %s767_s24 = scalar_lea.vmem %s32_s23, 4096  ;;  %p772_p6 = scmp.lt.s32.totalorder %s32_s23, %s32_s23 }
  0x12   :  { %p768_p5 = scmp.ne.s32.totalorder %s32_s23, %s767_s24  ;;  %p773_p7 = scmp.lt.s32.totalorder %s767_s24, %s767_s24 }
  0x14   :  { %p774_p8 = por %p773_p7, %p772_p6 }
  0x16   :  { %p775_p9 = pnand %p774_p8, %p768_p5 }
  0x18   :  { %778 = shalt.err (!%p775_p9)
}
  0x19   :  { %s831_s25 = smov 64   ;;  %s832_s26 = smov 4  }
  0x1a   :  { %37 = dma.hbm_to_vmem [thread:$0]  %s888_s1, 4096, %s32_s23, [#allocation6], %s831_s25, %s831_s25, %s832_s26  }
  0x1b   :  { %819 = dma.done.wait [#allocation3], 4096  }
  0x1c   :  { %820 = vsyncadd [#allocation3], 4294963200 }
  0x1d   :  { %821 = dma.done.wait [#allocation6], 4096  }
  0x1e   :  { %822 = vsyncadd [#allocation6], 4294963200  ;;  %v707_v0 = vld [vmem:[#allocation5 + $0x78] sm:$0xff]   ;;  %v711_v4 = vld [vmem:[#allocation5 + $0x70] sm:$0xff]  }
  0x1f   :  { %v708_v1 = vld [vmem:[#allocation5 + $0xf8] sm:$0xff]   ;;  %617 = vmatprep.subr.bf16.mxu0 %v707_v0  ;;  %v712_v5 = vld [vmem:[#allocation5 + $0xf0] sm:$0xff]   ;;  %v715_v8 = vld [vmem:[#allocation5 + $0x68] sm:$0xff]  }
  0x20   :  { %v709_v2 = vld [vmem:[#allocation5 + $0x38] sm:$0xff]   ;;  %657 = vmatprep.subr.bf16.mxu1 %v708_v1  ;;  %v713_v6 = vld [vmem:[#allocation5 + $0x30] sm:$0xff]   ;;  %v716_v9 = vld [vmem:[#allocation5 + $0xe8] sm:$0xff]  }
  0x21   :  { %v710_v3 = vld [vmem:[#allocation5 + $0xb8] sm:$0xff]   ;;  %618 = vmatpush3.bf16.msra.mxu0 %v709_v2  ;;  %v714_v7 = vld [vmem:[#allocation5 + $0xb0] sm:$0xff]   ;;  %v717_v10 = vld [vmem:[#allocation5 + $0x28] sm:$0xff]  }
  0x22   :  { %658 = vmatpush3.bf16.msra.mxu1 %v710_v3  ;;  %619 = vmatprep.subr.bf16.mxu0 %v711_v4  ;;  %v718_v11 = vld [vmem:[#allocation5 + $0xa8] sm:$0xff]   ;;  %v719_v12 = vld [vmem:[#allocation5 + $0x60] sm:$0xff]   ;;  %v723_v16 = vld [vmem:[#allocation5 + $0x58] sm:$0xff]  }
  0x23   :  { %659 = vmatprep.subr.bf16.mxu1 %v712_v5  ;;  %v720_v13 = vld [vmem:[#allocation5 + $0xe0] sm:$0xff]   ;;  %v724_v17 = vld [vmem:[#allocation5 + $0xd8] sm:$0xff]   ;;  %v727_v20 = vld [vmem:[#allocation5 + $0x50] sm:$0xff]  }
  0x24   :  { %v721_v14 = vld [vmem:[#allocation5 + $0x20] sm:$0xff]   ;;  %v725_v18 = vld [vmem:[#allocation5 + $0x18] sm:$0xff]   ;;  %v728_v21 = vld [vmem:[#allocation5 + $0xd0] sm:$0xff]  }
  0x25   :  { %620 = vmatpush3.bf16.msra.mxu0 %v713_v6  ;;  %v722_v15 = vld [vmem:[#allocation5 + $0xa0] sm:$0xff]   ;;  %v726_v19 = vld [vmem:[#allocation5 + $0x98] sm:$0xff]   ;;  %v729_v22 = vld [vmem:[#allocation5 + $0x10] sm:$0xff]  }
  0x26   :  { %660 = vmatpush3.bf16.msra.mxu1 %v714_v7  ;;  %621 = vmatprep.subr.bf16.mxu0 %v715_v8  ;;  %v730_v23 = vld [vmem:[#allocation5 + $0x90] sm:$0xff]   ;;  %v731_v24 = vld [vmem:[#allocation5 + $0x48] sm:$0xff]   ;;  %v735_v28 = vld [vmem:[#allocation5 + $0x40] sm:$0xff]  }
  0x27   :  { %661 = vmatprep.subr.bf16.mxu1 %v716_v9  ;;  %v732_v25 = vld [vmem:[#allocation5 + $0xc8] sm:$0xff]   ;;  %v736_v29 = vld [vmem:[#allocation5 + $0xc0] sm:$0xff]   ;;  %v141_v34 = vld [vmem:[#allocation2 + $0x18] sm:$0xff] }
  0x28   :  { %v733_v26 = vld [vmem:[#allocation5 + $0x8] sm:$0xff]   ;;  %v737_v30 = vld [vmem:[#allocation5] sm:$0xff]   ;;  %v145_v36 = vld [vmem:[#allocation2 + $0x38] sm:$0xff] }
  0x29   :  { %622 = vmatpush3.bf16.msra.mxu0 %v717_v10  ;;  %v734_v27 = vld [vmem:[#allocation5 + $0x88] sm:$0xff]   ;;  %v738_v31 = vld [vmem:[#allocation5 + $0x80] sm:$0xff]   ;;  %v173_v39 = vpack.c.bf16 %v145_v36, %v141_v34  ;;  %v140_v41 = vld [vmem:[#allocation2 + $0x10] sm:$0xff] }
  0x2a   :  { %662 = vmatpush3.bf16.msra.mxu1 %v718_v11  ;;  %623 = vmatprep.subr.bf16.mxu0 %v719_v12  ;;  %v139_v32 = vld [vmem:[#allocation2 + $0x8] sm:$0xff]  ;;  %v138_v37 = vld [vmem:[#allocation2] sm:$0xff]  ;;  %v144_v42 = vld [vmem:[#allocation2 + $0x30] sm:$0xff] }
  0x2b   :  { %663 = vmatprep.subr.bf16.mxu1 %v720_v13  ;;  %v143_v33 = vld [vmem:[#allocation2 + $0x28] sm:$0xff]  ;;  %v142_v38 = vld [vmem:[#allocation2 + $0x20] sm:$0xff]  ;;  %v172_v44 = vpack.c.bf16 %v144_v42, %v140_v41  ;;  %v149_v46 = vld [vmem:[#allocation2 + $0x58] sm:$0xff]  ;;  %475 = vmatprep.mubr.bf16.mxu1 %v173_v39 }
  0x2c   :  { %v171_v35 = vpack.c.bf16 %v143_v33, %v139_v32  ;;  %v170_v40 = vpack.c.bf16 %v142_v38, %v138_v37  ;;  %v147_v43 = vld [vmem:[#allocation2 + $0x48] sm:$0xff]  ;;  %v153_v47 = vld [vmem:[#allocation2 + $0x78] sm:$0xff]  ;;  %v146_v50 = vld [vmem:[#allocation2 + $0x40] sm:$0xff] }
  0x2d   :  { %624 = vmatpush3.bf16.msra.mxu0 %v721_v14  ;;  %v151_v45 = vld [vmem:[#allocation2 + $0x68] sm:$0xff]  ;;  %v177_v49 = vpack.c.bf16 %v153_v47, %v149_v46  ;;  %v150_v51 = vld [vmem:[#allocation2 + $0x60] sm:$0xff]  ;;  %v148_v52 = vld [vmem:[#allocation2 + $0x50] sm:$0xff] }
  0x2e   :  { %664 = vmatpush3.bf16.msra.mxu1 %v722_v15  ;;  %625 = vmatprep.subr.bf16.mxu0 %v723_v16  ;;  %v175_v48 = vpack.c.bf16 %v151_v45, %v147_v43  ;;  %v152_v53 = vld [vmem:[#allocation2 + $0x70] sm:$0xff]  ;;  %v155_v54 = vld [vmem:[#allocation2 + $0x88] sm:$0xff]  ;;  %v157_v56 = vld [vmem:[#allocation2 + $0x98] sm:$0xff]  ;;  %v174_v58 = vpack.c.bf16 %v150_v51, %v146_v50 }
  0x2f   :  { %665 = vmatprep.subr.bf16.mxu1 %v724_v17  ;;  %410 = vmatprep.mubr.bf16.mxu0 %v171_v35  ;;  %v159_v55 = vld [vmem:[#allocation2 + $0xa8] sm:$0xff]  ;;  %v161_v57 = vld [vmem:[#allocation2 + $0xb8] sm:$0xff]  ;;  %v176_v59 = vpack.c.bf16 %v152_v53, %v148_v52  ;;  %v154_v62 = vld [vmem:[#allocation2 + $0x80] sm:$0xff] }
  0x30   :  { %v179_v60 = vpack.c.bf16 %v159_v55, %v155_v54  ;;  %v181_v61 = vpack.c.bf16 %v161_v57, %v157_v56  ;;  %v158_v63 = vld [vmem:[#allocation2 + $0xa0] sm:$0xff]  ;;  %v156_v0 = vld [vmem:[#allocation2 + $0x90] sm:$0xff]  ;;  %v163_v2 = vld [vmem:[#allocation2 + $0xc8] sm:$0xff] }
  0x31   :  { %626 = vmatpush3.bf16.msra.mxu0 %v725_v18  ;;  %v160_v1 = vld [vmem:[#allocation2 + $0xb0] sm:$0xff]  ;;  %v167_v3 = vld [vmem:[#allocation2 + $0xe8] sm:$0xff]  ;;  %v165_v4 = vld [vmem:[#allocation2 + $0xd8] sm:$0xff]  ;;  %v178_v6 = vpack.c.bf16 %v158_v63, %v154_v62 }
  0x32   :  { %666 = vmatpush3.bf16.msra.mxu1 %v726_v19  ;;  %627 = vmatprep.subr.bf16.mxu0 %v727_v20  ;;  %v169_v5 = vld [vmem:[#allocation2 + $0xf8] sm:$0xff]  ;;  %v180_v7 = vpack.c.bf16 %v160_v1, %v156_v0  ;;  %v183_v8 = vpack.c.bf16 %v167_v3, %v163_v2  ;;  %v162_v10 = vld [vmem:[#allocation2 + $0xc0] sm:$0xff]  ;;  %v164_v12 = vld [vmem:[#allocation2 + $0xd0] sm:$0xff] }
  0x33   :  { %667 = vmatprep.subr.bf16.mxu1 %v728_v21  ;;  %v185_v9 = vpack.c.bf16 %v169_v5, %v165_v4  ;;  %v166_v11 = vld [vmem:[#allocation2 + $0xe0] sm:$0xff]  ;;  %v168_v13 = vld [vmem:[#allocation2 + $0xf0] sm:$0xff] }
  0x34   :  { %v182_v14 = vpack.c.bf16 %v166_v11, %v162_v10  ;;  %v184_v15 = vpack.c.bf16 %v168_v13, %v164_v12 }
  0x35   :  { %628 = vmatpush3.bf16.msra.mxu0 %v729_v22 }
  0x36   :  { %668 = vmatpush3.bf16.msra.mxu1 %v730_v23  ;;  %629 = vmatprep.subr.bf16.mxu0 %v731_v24  ;;  %v871_v23 = vld [vmem:[%s889_s2] ss:$0 sm:$0xff]  ;;  %s833_s2 = smov [#allocation8]  }
  0x37   :  { %669 = vmatprep.subr.bf16.mxu1 %v732_v25  ;;  %s567_s29 = sshll.u32 %s833_s2, 4  ;;  %s568_s29 = int_to_ptr.vmem [resolvable:$true] %s567_s29 }
  0x38   :  { %s779_s30 = scalar_lea.vmem %s568_s29, 1024  ;;  %p784_p11 = scmp.lt.s32.totalorder %s568_s29, %s568_s29 }
  0x39   :  { %630 = vmatpush3.bf16.msra.mxu0 %v733_v26  ;;  %p780_p10 = scmp.ne.s32.totalorder %s568_s29, %s779_s30  ;;  %p785_p12 = scmp.lt.s32.totalorder %s779_s30, %s779_s30 }
  0x3a   :  { %670 = vmatpush3.bf16.msra.mxu1 %v734_v27  ;;  %631 = vmatprep.subr.bf16.mxu0 %v735_v28 }
  0x3b   :  { %671 = vmatprep.subr.bf16.mxu1 %v736_v29  ;;  %p786_p13 = por %p785_p12, %p784_p11 }
  0x3d   :  { %632 = vmatpush3.bf16.msra.mxu0 %v737_v30  ;;  %p787_p0 = pnand %p786_p13, %p780_p10 }
  0x3e   :  { %672 = vmatpush3.bf16.msra.mxu1 %v738_v31 }
  0x40   :  { %411 = vmatmul.mubr.bf16.vlgmr.msra.gmra.mxu0 %v170_v40 }
  0x41   :  { %476 = vmatmul.mubr.bf16.vlgmr.msra.gmra.mxu1 %v172_v44  ;;  %418 = vmatprep.mubr.bf16.mxu0 %v175_v48 }
  0x42   :  { %483 = vmatprep.mubr.bf16.mxu1 %v177_v49 }
  0x48   :  { %419 = vmatmul.mubr.bf16.gmra.mxu0 %v174_v58 }
  0x49   :  { %484 = vmatmul.mubr.bf16.gmra.mxu1 %v176_v59  ;;  %426 = vmatprep.mubr.bf16.mxu0 %v179_v60 }
  0x4a   :  { %491 = vmatprep.mubr.bf16.mxu1 %v181_v61 }
  0x50   :  { %427 = vmatmul.mubr.bf16.gmra.mxu0 %v178_v6 }
  0x51   :  { %492 = vmatmul.mubr.bf16.gmra.mxu1 %v180_v7  ;;  %434 = vmatprep.mubr.bf16.mxu0 %v183_v8 }
  0x52   :  { %499 = vmatprep.mubr.bf16.mxu1 %v185_v9 }
  0x58   :  { %435 = vmatmul.mubr.bf16.gmra.mxu0 %v182_v14 }
  0x59   :  { %500 = vmatmul.mubr.bf16.gmra.mxu1 %v184_v15 }
 0x100   :  { %v633_v16 = vpop.f32.mrf.mxu0 }
 0x101   :  { %v673_v17 = vpop.f32.mrf.mxu1 }
 0x102   :  { %v634_v18 = vpop.f32.mrf.mxu0 }
 0x103   :  { %v635_v19 = vadd.f32 %v634_v18, %v633_v16  ;;  %v674_v20 = vpop.f32.mrf.mxu1 }
 0x104   :  { %v675_v21 = vadd.f32 %v674_v20, %v673_v17  ;;  %v636_v22 = vpop.f32.mrf.mxu0 }
 0x105   :  { %v676_v24 = vpop.f32.mrf.mxu1 }
 0x106   :  { %v478_v25 = vadd.f32 %v675_v21, %v635_v19  ;;  %v637_v26 = vpop.f32.mrf.mxu0 }
 0x107   :  { %v638_v27 = vadd.f32 %v637_v26, %v636_v22  ;;  %v677_v28 = vpop.f32.mrf.mxu1 }
 0x108   :  { %v508_v29 = vadd.f32 %v871_v23, %v478_v25  ;;  %v678_v30 = vadd.f32 %v677_v28, %v676_v24  ;;  %v639_v31 = vpop.f32.mrf.mxu0 }
 0x109   :  { %v679_v32 = vpop.f32.mrf.mxu1 }
 0x10a   :  { %516 = vst [vmem:[#allocation8] sm:$0xff] %v508_v29  ;;  %v481_v33 = vadd.f32 %v678_v30, %v638_v27  ;;  %v640_v34 = vpop.f32.mrf.mxu0 }
 0x10b   :  { %v641_v35 = vadd.f32 %v640_v34, %v639_v31  ;;  %v680_v36 = vpop.f32.mrf.mxu1 }
 0x10c   :  { %v509_v37 = vadd.f32 %v871_v23, %v481_v33  ;;  %v681_v38 = vadd.f32 %v680_v36, %v679_v32  ;;  %v642_v39 = vpop.f32.mrf.mxu0 }
 0x10d   :  { %v682_v40 = vpop.f32.mrf.mxu1 }
 0x10e   :  { %517 = vst [vmem:[#allocation8 + $0x8] sm:$0xff] %v509_v37  ;;  %v486_v41 = vadd.f32 %v681_v38, %v641_v35  ;;  %v643_v42 = vpop.f32.mrf.mxu0 }
 0x10f   :  { %v644_v43 = vadd.f32 %v643_v42, %v642_v39  ;;  %v683_v44 = vpop.f32.mrf.mxu1 }
 0x110   :  { %v510_v45 = vadd.f32 %v871_v23, %v486_v41  ;;  %v684_v46 = vadd.f32 %v683_v44, %v682_v40  ;;  %v645_v47 = vpop.f32.mrf.mxu0 }
 0x111   :  { %v685_v48 = vpop.f32.mrf.mxu1 }
 0x112   :  { %518 = vst [vmem:[#allocation8 + $0x10] sm:$0xff] %v510_v45  ;;  %v489_v49 = vadd.f32 %v684_v46, %v644_v43  ;;  %v646_v50 = vpop.f32.mrf.mxu0 }
 0x113   :  { %v647_v51 = vadd.f32 %v646_v50, %v645_v47  ;;  %v686_v52 = vpop.f32.mrf.mxu1 }
 0x114   :  { %v511_v53 = vadd.f32 %v871_v23, %v489_v49  ;;  %v687_v54 = vadd.f32 %v686_v52, %v685_v48  ;;  %v648_v55 = vpop.f32.mrf.mxu0 }
 0x115   :  { %v688_v56 = vpop.f32.mrf.mxu1 }
 0x116   :  { %519 = vst [vmem:[#allocation8 + $0x18] sm:$0xff] %v511_v53  ;;  %v494_v57 = vadd.f32 %v687_v54, %v647_v51  ;;  %v649_v58 = vpop.f32.mrf.mxu0 }
 0x117   :  { %v650_v59 = vadd.f32 %v649_v58, %v648_v55  ;;  %v689_v60 = vpop.f32.mrf.mxu1 }
 0x118   :  { %v512_v61 = vadd.f32 %v871_v23, %v494_v57  ;;  %v690_v62 = vadd.f32 %v689_v60, %v688_v56  ;;  %v651_v63 = vpop.f32.mrf.mxu0 }
 0x119   :  { %v691_v0 = vpop.f32.mrf.mxu1 }
 0x11a   :  { %520 = vst [vmem:[#allocation8 + $0x20] sm:$0xff] %v512_v61  ;;  %v497_v1 = vadd.f32 %v690_v62, %v650_v59  ;;  %v652_v2 = vpop.f32.mrf.mxu0 }
 0x11b   :  { %v653_v3 = vadd.f32 %v652_v2, %v651_v63  ;;  %v692_v4 = vpop.f32.mrf.mxu1 }
 0x11c   :  { %v513_v5 = vadd.f32 %v871_v23, %v497_v1  ;;  %v693_v6 = vadd.f32 %v692_v4, %v691_v0  ;;  %v654_v7 = vpop.f32.mrf.mxu0 }
 0x11d   :  { %v694_v8 = vpop.f32.mrf.mxu1  ;;  %v527_v9 = vld [vmem:[#allocation8] ss:$4 sm:$0xff]  ;;  %v531_v10 = vld [vmem:[#allocation8 + $0x1] ss:$4 sm:$0xff]  ;;  %v537_v16 = vld [vmem:[#allocation8 + $0x2] ss:$4 sm:$0xff] }
 0x11e   :  { %521 = vst [vmem:[#allocation8 + $0x28] sm:$0xff] %v513_v5  ;;  %v502_v11 = vadd.f32 %v693_v6, %v653_v3  ;;  %v655_v12 = vpop.f32.mrf.mxu0  ;;  %v534_v13 = vmax.f32 %v527_v9, %v531_v10  ;;  %v543_v20 = vld [vmem:[#allocation8 + $0x3] ss:$4 sm:$0xff] }
 0x11f   :  { %v656_v14 = vadd.f32 %v655_v12, %v654_v7  ;;  %v695_v15 = vpop.f32.mrf.mxu1 }
 0x120   :  { %v514_v17 = vadd.f32 %v871_v23, %v502_v11  ;;  %v696_v18 = vadd.f32 %v695_v15, %v694_v8  ;;  %v540_v19 = vmax.f32 %v534_v13, %v537_v16 }
 0x122   :  { %522 = vst [vmem:[#allocation8 + $0x30] sm:$0xff] %v514_v17  ;;  %v505_v21 = vadd.f32 %v696_v18, %v656_v14  ;;  %v546_v22 = vmax.f32 %v540_v19, %v543_v20 }
 0x124   :  { %v515_v24 = vadd.f32 %v871_v23, %v505_v21  ;;  %548 = vst [vmem:[#allocation7] sm:$0xff] %v546_v22 }
 0x126   :  { %523 = vst [vmem:[#allocation8 + $0x38] sm:$0xff] %v515_v24 }
 0x127   :  { %790 = shalt.err (!%p787_p0)
}
 0x128   :  { %s834_s5 = smov 128   ;;  %s835_s6 = smov 8  }
 0x129   :  { %573 = dma.vmem_to_hbm [thread:$0]  %s568_s29, 1024, %s891_s4, [#allocation9], %s834_s5, %s834_s5, %s835_s6  }
 0x12a   :  { %s836_s9 = smov [#allocation7]  }
 0x12b   :  { %s555_s10 = sshll.u32 %s836_s9, 4  ;;  %s556_s10 = int_to_ptr.vmem [resolvable:$true] %s555_s10 }
 0x12c   :  { %s799_s11 = scalar_lea.vmem %s556_s10, 256  ;;  %p804_p2 = scmp.lt.s32.totalorder %s556_s10, %s556_s10 }
 0x12d   :  { %v529_v25 = vld [vmem:[#allocation8 + $0x20] ss:$4 sm:$0xff]  ;;  %v533_v26 = vld [vmem:[#allocation8 + $0x21] ss:$4 sm:$0xff]  ;;  %v539_v23 = vld [vmem:[#allocation8 + $0x22] ss:$4 sm:$0xff]  ;;  %p800_p1 = scmp.ne.s32.totalorder %s556_s10, %s799_s11  ;;  %p805_p3 = scmp.lt.s32.totalorder %s799_s11, %s799_s11 }
 0x12e   :  { %v535_v27 = vmax.f32 %v529_v25, %v533_v26  ;;  %v545_v29 = vld [vmem:[#allocation8 + $0x23] ss:$4 sm:$0xff] }
 0x12f   :  { %p806_p4 = por %p805_p3, %p804_p2 }
 0x130   :  { %v541_v28 = vmax.f32 %v535_v27, %v539_v23 }
 0x131   :  { %p807_p5 = pnand %p806_p4, %p800_p1 }
 0x132   :  { %v547_v30 = vmax.f32 %v541_v28, %v545_v29 }
 0x134   :  { %549 = vst [vmem:[#allocation7 + $0x8] sm:$0xff] %v547_v30 }
 0x135   :  { %810 = shalt.err (!%p807_p5)
}
 0x136   :  { %561 = dma.vmem_to_hbm [thread:$0]  %s556_s10, 256, %s890_s3, [#allocation4], %s834_s5, %s834_s5, %s835_s6  }
 0x137   :  { %823 = dma.done.wait [#allocation4], 256  }
 0x138   :  { %824 = vsyncadd [#allocation4], 4294967040 }
 0x139   :  { %825 = dma.done.wait [#allocation9], 1024  }
 0x13a   :  { %826 = vsyncadd [#allocation9], 4294966272 }
 0x13b   :  { %580 = vsyncpa [#allocation3], 1 }
 0x13c   :  { %581 = vsyncpa [#allocation6], 1 }
 0x13d   :  { %582 = vsyncpa [#allocation4], 1 }
 0x13e   :  { %583 = vsyncpa [#allocation9], 1 }

</bundles_post_ra>
